<compile_context>
chip_gen: v5e
topology: v5e:2x2
jax: 0.10.0
libtpu: 0.0.40
codegen_flags: <defaults>
</compile_context>

<pallas_src>
import functools

import jax
import jax.numpy as jnp
from jax.experimental import pallas as pl
from jax.experimental.pallas import tpu as pltpu

LN_EPS = 1e-5  # PyTorch nn.LayerNorm default


def _context_block_kernel(x_ref, wm_ref, w1_ref, b1_ref, g_ref, beta_ref,
                          w2_ref, b2_ref, o_ref, *, slab_precision):
    bt, C, HW = x_ref.shape
    exact = jax.lax.Precision.HIGHEST

    x = x_ref[...]                                                   # (Bt, C, HW) io dtype

    # --- attention pooling: conv_mask 1x1 + softmax over spatial --------------------
    # conv_mask bias is a per-image constant on every spatial logit; softmax is
    # shift-invariant so it cancels exactly and is not loaded at all.
    wm = jnp.broadcast_to(wm_ref[...].astype(x.dtype)[None], (bt, 1, C))   # (Bt,1,C) tiny
    logits = jnp.einsum("boc,bcs->bos", wm, x,
                        preferred_element_type=jnp.float32,
                        precision=slab_precision)                          # (Bt,1,HW) f32
    m = jnp.max(logits, axis=-1, keepdims=True)                            # (Bt,1,1)
    p = jnp.exp(logits - m)                                                # (Bt,1,HW) f32
    sum_p = jnp.sum(p, axis=-1, keepdims=True)                             # (Bt,1,1)

    # Pool on the MXU (contract HW) into a lane-dense (Bt,1,C) context; fold the softmax
    # normalization into the context scale (no (C,HW) temporary, no (·,HW) divide).
    ctx = jnp.einsum("bos,bcs->boc", p.astype(x.dtype), x,
                     preferred_element_type=jnp.float32,
                     precision=slab_precision)                             # (Bt,1,C) f32
    ctx = ctx * pl.reciprocal(sum_p, approx=False)

    # --- channel_add bottleneck: 1x1 conv -> LayerNorm([P,1,1]) -> ReLU -> 1x1 conv ---
    # Plain 2-D weights (no per-batch broadcast copies); outputs stay lane-dense.
    y1 = jnp.einsum("boc,pc->bop", ctx, w1_ref[...],
                    preferred_element_type=jnp.float32, precision=exact)   # (Bt,1,P)
    y1 = y1 + b1_ref[...]                                                  # (1,1,P)
    mu = jnp.mean(y1, axis=-1, keepdims=True)                              # (Bt,1,1)
    var = jnp.mean(jnp.square(y1 - mu), axis=-1, keepdims=True)            # biased var
    y1 = (y1 - mu) * jax.lax.rsqrt(var + LN_EPS)
    y1 = y1 * g_ref[...] + beta_ref[...]
    y1 = jnp.maximum(y1, 0.0)                                              # ReLU

    y2 = jnp.einsum("bop,cp->boc", y1, w2_ref[...],
                    preferred_element_type=jnp.float32, precision=exact)   # (Bt,1,C)
    y2 = y2 + b2_ref[...]                                                  # (1,1,C)

    # --- fusion: broadcast add over the spatial (lane) axis --------------------------
    y2 = jnp.swapaxes(y2, 1, 2)                                            # (Bt,C,1) tiny relayout
    o_ref[...] = (x + y2.astype(x.dtype)).astype(o_ref.dtype)


@functools.lru_cache(maxsize=None)
def _tpu_generation_info():
    """(vmem_capacity_bytes, tensorcores_per_chip) with conservative fallbacks."""
    vmem = None
    cores = None
    try:
        info = pltpu.get_tpu_info()
        for name in ("vmem_capacity_bytes", "vmem_size_bytes", "vmem_bytes"):
            v = getattr(info, name, None)
            if v:
                vmem = int(v)
                break
        for name in ("num_tensorcores", "tensorcores_per_chip", "num_cores"):
            v = getattr(info, name, None)
            if v:
                cores = int(v)
                break
    except Exception:
        pass
    if vmem is None:
        vmem = 64 << 20          # conservative: v7x has 64 MiB VMEM per TensorCore
    if cores is None:
        kind = ""
        try:
            kind = jax.devices()[0].device_kind.lower()
        except Exception:
            pass
        # lite chips (v5e/v6e) have a single TensorCore; v4/v5p/v7x have two.
        cores = 1 if ("lite" in kind or "v5e" in kind or "v6e" in kind) else 2
    return vmem, cores


def _pick_block_batch(B, per_image_bytes, target_bytes, num_cores):
    """Largest divisor of B whose input slab fits ~target_bytes.

    On multi-TensorCore chips (v7x megacore) prefer a grid that splits evenly across
    cores with >=2 steps per core (keeps per-core DMA/compute pipelining alive); on
    single-core chips (v5e/v6e) just maximize the block.
    """
    divisors = [d for d in range(1, B + 1) if B % d == 0]
    fits = [d for d in divisors if d * per_image_bytes <= target_bytes] or [1]
    if num_cores > 1:
        balanced = [d for d in fits
                    if (B // d) % num_cores == 0 and (B // d) // num_cores >= 2]
        if balanced:
            return max(balanced)
    return max(fits)


def _context_block_impl(x_nchw, params, *, bt, vmem_limit, out_dtype, alias,
                        slab_precision):
    B, C, H, W = x_nchw.shape
    HW = H * W
    P = params["w1"].shape[0]
    f32 = jnp.float32

    x = x_nchw.reshape(B, C, HW)          # bitcast inside jit; no extra HBM pass

    # Lane-dense parameter shapes (avoid (C,1)/(P,1) sublane-padded operands).
    wm = params["wm"].reshape(1, C).astype(f32)
    w1 = params["w1"].astype(f32)                      # (P, C)
    w2 = params["w2"].astype(f32)                      # (C, P)
    b1 = params["b1"].reshape(1, 1, P).astype(f32)
    g = params["gamma"].reshape(1, 1, P).astype(f32)
    be = params["beta"].reshape(1, 1, P).astype(f32)
    b2 = params["b2"].reshape(1, 1, C).astype(f32)

    grid = (B // bt,)
    full = lambda shape: pl.BlockSpec(shape, lambda b: (0,) * len(shape))
    kernel = functools.partial(_context_block_kernel, slab_precision=slab_precision)

    out = pl.pallas_call(
        kernel,
        out_shape=jax.ShapeDtypeStruct((B, C, HW), out_dtype),
        grid_spec=pltpu.PrefetchScalarGridSpec(
            num_scalar_prefetch=0,
            grid=grid,
            in_specs=[
                pl.BlockSpec((bt, C, HW), lambda b: (b, 0, 0)),   # x slab
                full((1, C)),     # conv_mask weight (bias dropped: softmax shift-invariant)
                full((P, C)),     # channel_add conv1 weight
                full((1, 1, P)),  # channel_add conv1 bias   (lane-dense)
                full((1, 1, P)),  # LayerNorm gamma          (lane-dense)
                full((1, 1, P)),  # LayerNorm beta           (lane-dense)
                full((C, P)),     # channel_add conv2 weight
                full((1, 1, C)),  # channel_add conv2 bias   (lane-dense)
            ],
            out_specs=pl.BlockSpec((bt, C, HW), lambda b: (b, 0, 0)),
        ),
        input_output_aliases=({0: 0} if alias else {}),
        compiler_params=pltpu.CompilerParams(
            dimension_semantics=("parallel",),
            vmem_limit_bytes=vmem_limit),
    )(x, wm, w1, b1, g, be, w2, b2)

    return out.reshape(B, C, H, W)


_STATIC = ("bt", "vmem_limit", "out_dtype", "alias", "slab_precision")
_cb_jit = jax.jit(_context_block_impl, static_argnames=_STATIC)
_cb_jit_donate = jax.jit(_context_block_impl, static_argnames=_STATIC,
                         donate_argnums=(0,))


def context_block2d(x_nchw, params, *, io_dtype=None, donate_x=False,
                    slab_precision=None):
    """x_nchw: (B, C, H, W). Returns (B, C, H, W) in io_dtype (default: x's dtype).

    io_dtype=jnp.bfloat16 halves the output-side HBM traffic (compute stays f32).
    donate_x=True (with io_dtype matching x's dtype) donates x so the residual-add
    output aliases it in place — the caller must not reuse x afterwards.
    """
    B, C, H, W = x_nchw.shape
    HW = H * W
    in_dt = jnp.dtype(x_nchw.dtype)
    out_dt = jnp.dtype(io_dtype) if io_dtype is not None else in_dt
    if slab_precision is None:
        slab_precision = (jax.lax.Precision.HIGHEST if in_dt == jnp.dtype(jnp.float32)
                          else jax.lax.Precision.DEFAULT)

    vmem_cap, num_cores = _tpu_generation_info()
    # Target input block ~= 1/8 of VMEM (~16 MiB on v5e/v6e, ~8 MiB on v7x).
    target = max(vmem_cap // 8, 1 << 20)
    bt = _pick_block_batch(B, C * HW * in_dt.itemsize, target, num_cores)

    # in + out blocks, double-buffered, plus headroom for weights/intermediates,
    # capped at 75% of the chip's physical VMEM (respects v7x's 64 MiB).
    block_bytes = bt * C * HW * (in_dt.itemsize + out_dt.itemsize)
    vmem_limit = int(min(max(2 * block_bytes + (6 << 20), 32 << 20),
                         (vmem_cap * 3) // 4))

    alias = bool(donate_x) and (out_dt == in_dt)
    fn = _cb_jit_donate if alias else _cb_jit
    return fn(x_nchw, params, bt=bt, vmem_limit=vmem_limit, out_dtype=out_dt,
              alias=alias, slab_precision=slab_precision)


def make_params(key, inplanes, planes):
    # Deterministic synthetic init (shapes from ContextBlock2d.__init__).
    # NOTE: the PyTorch module zero-inits the last conv of channel_add_conv;
    # we use small non-zero values here so the kernel path is actually exercised.
    ks = jax.random.split(key, 6)
    n = lambda k, s: (jax.random.normal(k, s, jnp.float32) * 0.1)
    return {
        "wm":    n(ks[0], (1, inplanes)),        # conv_mask.weight (1, C, 1, 1) -> (1, C)
        "bm":    n(ks[1], (1, 1)),               # conv_mask.bias (no-op through softmax)
        "w1":    n(ks[2], (planes, inplanes)),   # channel_add[0].weight
        "b1":    n(ks[3], (planes, 1)),          # channel_add[0].bias
        "gamma": jnp.ones((planes, 1), jnp.float32),   # LayerNorm weight
        "beta":  jnp.zeros((planes, 1), jnp.float32),  # LayerNorm bias
        "w2":    n(ks[4], (inplanes, planes)),   # channel_add[3].weight
        "b2":    n(ks[5], (inplanes, 1)),        # channel_add[3].bias
    }


def reference(x_nchw, params):
    """Pure-JAX reference mirroring the PyTorch forward (pool='att', channel_add)."""
    B, C, H, W = x_nchw.shape
    hi = jax.lax.Precision.HIGHEST
    x = x_nchw.astype(jnp.float32).reshape(B, C, H * W)
    logits = jnp.einsum("oc,bcs->bos", params["wm"], x,
                        precision=hi) + params["bm"][0, 0]                     # (B,1,HW)
    attn = jax.nn.softmax(logits, axis=-1)
    ctx = jnp.einsum("bcs,bos->bc", x, attn, precision=hi)[..., None]          # (B,C,1)
    y1 = jnp.einsum("pc,bcx->bpx", params["w1"], ctx,
                    precision=hi) + params["b1"][None]                         # (B,P,1)
    mu = jnp.mean(y1, axis=(1, 2), keepdims=True)
    var = jnp.mean((y1 - mu) ** 2, axis=(1, 2), keepdims=True)
    y1 = (y1 - mu) / jnp.sqrt(var + LN_EPS) * params["gamma"][None] + params["beta"][None]
    y1 = jnp.maximum(y1, 0.0)
    y2 = jnp.einsum("cp,bpx->bcx", params["w2"], y1,
                    precision=hi) + params["b2"][None]                         # (B,C,1)
    return (x + y2).reshape(B, C, H, W)


if __name__ == "__main__":
    key = jax.random.PRNGKey(0)
    kx, kx2, kp = jax.random.split(key, 3)

    # --- strict f32 correctness check, donated + aliased in-place residual add ---
    B, C, H, W = 2, 4, 16, 16            # inplanes=4
    planes = 2
    x = jax.random.normal(kx, (B, C, H, W), jnp.float32)
    params = make_params(kp, C, planes)

    ref = reference(x, params)           # compute the reference BEFORE donating x
    out = context_block2d(x, params, donate_x=True)
    jax.block_until_ready(out)
    assert out.shape == (B, C, H, W) and out.dtype == jnp.float32
    assert jnp.allclose(out, ref, atol=1e-4, rtol=1e-4), "f32 mismatch vs reference"

    # --- bf16 output path (f32 in, bf16 out; no alias), batched grid steps ---
    B2 = 8
    x2 = jax.random.normal(kx2, (B2, C, H, W), jnp.float32)
    ref2 = reference(x2, params)
    out2 = context_block2d(x2, params, io_dtype=jnp.bfloat16)
    jax.block_until_ready(out2)
    assert out2.shape == (B2, C, H, W) and out2.dtype == jnp.bfloat16
    assert jnp.allclose(out2.astype(jnp.float32), ref2, atol=3e-2, rtol=3e-2), \
        "bf16 mismatch vs reference"

    print("KERNEL_OK")
</pallas_src>

<mosaic_0001>
module attributes {stable_mosaic.version = 11 : i64} {
  func.func @_context_block_kernel(%arg0: i32, %arg1: memref<2x4x256xf32, #tpu.memory_space<vmem>>, %arg2: memref<1x4xf32, #tpu.memory_space<vmem>>, %arg3: memref<2x4xf32, #tpu.memory_space<vmem>>, %arg4: memref<1x1x2xf32, #tpu.memory_space<vmem>>, %arg5: memref<1x1x2xf32, #tpu.memory_space<vmem>>, %arg6: memref<1x1x2xf32, #tpu.memory_space<vmem>>, %arg7: memref<4x2xf32, #tpu.memory_space<vmem>>, %arg8: memref<1x1x4xf32, #tpu.memory_space<vmem>>, %arg9: memref<2x4x256xf32, #tpu.memory_space<vmem>>) attributes {dimension_semantics = [#tpu.dimension_semantics<parallel>], iteration_bounds = array<i64: 1>, scalar_prefetch = 0 : i64, scratch_operands = 0 : i64, tpu.core_type = #tpu.core_type<tc>, window_params = [{transform_indices = @transform_0, window_bounds = array<i64: 2, 4, 256>}, {pipeline_mode = #tpu.pipeline_mode<synchronous>, transform_indices = @transform_1, window_bounds = array<i64: 1, 4>}, {pipeline_mode = #tpu.pipeline_mode<synchronous>, transform_indices = @transform_2, window_bounds = array<i64: 2, 4>}, {pipeline_mode = #tpu.pipeline_mode<synchronous>, transform_indices = @transform_3, window_bounds = array<i64: 1, 1, 2>}, {pipeline_mode = #tpu.pipeline_mode<synchronous>, transform_indices = @transform_4, window_bounds = array<i64: 1, 1, 2>}, {pipeline_mode = #tpu.pipeline_mode<synchronous>, transform_indices = @transform_5, window_bounds = array<i64: 1, 1, 2>}, {pipeline_mode = #tpu.pipeline_mode<synchronous>, transform_indices = @transform_6, window_bounds = array<i64: 4, 2>}, {pipeline_mode = #tpu.pipeline_mode<synchronous>, transform_indices = @transform_7, window_bounds = array<i64: 1, 1, 4>}, {transform_indices = @transform_8, window_bounds = array<i64: 2, 4, 256>}]} {
    %c0 = arith.constant 0 : index
    %c0_0 = arith.constant 0 : index
    %c0_1 = arith.constant 0 : index
    %0 = vector.load %arg1[%c0, %c0_0, %c0_1] : memref<2x4x256xf32, #tpu.memory_space<vmem>>, vector<2x4x256xf32>
    %c0_2 = arith.constant 0 : index
    %c0_3 = arith.constant 0 : index
    %1 = vector.load %arg2[%c0_2, %c0_3] : memref<1x4xf32, #tpu.memory_space<vmem>>, vector<1x4xf32>
    %2 = vector.shape_cast %1 : vector<1x4xf32> to vector<1x1x4xf32>
    %3 = vector.shape_cast %2 : vector<1x1x4xf32> to vector<1x1x4xf32>
    %4 = vector.broadcast %3 : vector<1x1x4xf32> to vector<2x1x4xf32>
    "tpu.trace_start"() <{level = 10 : i32, message = "boc,bcs->bos"}> : () -> ()
    %cst = arith.constant dense<0.000000e+00> : vector<2x1x256xf32>
    %5 = tpu.matmul %4, %0, %cst {dimension_numbers = #tpu.dot_dimension_numbers<[2], [1], [1], [2], [0, 0, 0, 1, 1, 2], [0], [0]>, precision = #tpu.contract_precision<fp32>} : vector<2x1x4xf32>, vector<2x4x256xf32>, vector<2x1x256xf32> -> vector<2x1x256xf32>
    "tpu.trace_stop"() : () -> ()
    %cst_4 = arith.constant dense<0xFF800000> : vector<2x1xf32>
    %6 = vector.multi_reduction <maximumf>, %5, %cst_4 [2] : vector<2x1x256xf32> to vector<2x1xf32>
    %7 = vector.shape_cast %6 : vector<2x1xf32> to vector<2x1x1xf32>
    %8 = vector.broadcast %7 : vector<2x1x1xf32> to vector<2x1x256xf32>
    %9 = arith.subf %5, %8 : vector<2x1x256xf32>
    %10 = math.exp %9 : vector<2x1x256xf32>
    %cst_5 = arith.constant dense<0.000000e+00> : vector<2x1xf32>
    %11 = vector.multi_reduction <add>, %10, %cst_5 [2] : vector<2x1x256xf32> to vector<2x1xf32>
    %12 = vector.shape_cast %11 : vector<2x1xf32> to vector<2x1x1xf32>
    "tpu.trace_start"() <{level = 10 : i32, message = "bos,bcs->boc"}> : () -> ()
    %cst_6 = arith.constant dense<0.000000e+00> : vector<2x1x4xf32>
    %13 = tpu.matmul %10, %0, %cst_6 {dimension_numbers = #tpu.dot_dimension_numbers<[2], [2], [1], [1], [0, 0, 0, 1, 1, 1], [0], [0]>, precision = #tpu.contract_precision<fp32>} : vector<2x1x256xf32>, vector<2x4x256xf32>, vector<2x1x4xf32> -> vector<2x1x4xf32>
    "tpu.trace_stop"() : () -> ()
    %14 = tpu.reciprocal %12 : vector<2x1x1xf32> -> vector<2x1x1xf32>
    %15 = vector.broadcast %14 : vector<2x1x1xf32> to vector<2x1x4xf32>
    %16 = arith.mulf %13, %15 : vector<2x1x4xf32>
    %c0_7 = arith.constant 0 : index
    %c0_8 = arith.constant 0 : index
    %17 = vector.load %arg3[%c0_7, %c0_8] : memref<2x4xf32, #tpu.memory_space<vmem>>, vector<2x4xf32>
    "tpu.trace_start"() <{level = 10 : i32, message = "boc,pc->bop"}> : () -> ()
    %cst_9 = arith.constant dense<0.000000e+00> : vector<2x1x2xf32>
    %18 = tpu.matmul %16, %17, %cst_9 {dimension_numbers = #tpu.dot_dimension_numbers<[2], [1], [0, 1], [0], [0, 0, 0, 1, 1, 0], [], []>, precision = #tpu.contract_precision<fp32>} : vector<2x1x4xf32>, vector<2x4xf32>, vector<2x1x2xf32> -> vector<2x1x2xf32>
    "tpu.trace_stop"() : () -> ()
    %c0_10 = arith.constant 0 : index
    %c0_11 = arith.constant 0 : index
    %c0_12 = arith.constant 0 : index
    %19 = vector.load %arg4[%c0_10, %c0_11, %c0_12] : memref<1x1x2xf32, #tpu.memory_space<vmem>>, vector<1x1x2xf32>
    %20 = vector.broadcast %19 : vector<1x1x2xf32> to vector<2x1x2xf32>
    %21 = arith.addf %18, %20 : vector<2x1x2xf32>
    %cst_13 = arith.constant dense<0.000000e+00> : vector<2x1xf32>
    %22 = vector.multi_reduction <add>, %21, %cst_13 [2] : vector<2x1x2xf32> to vector<2x1xf32>
    %23 = vector.shape_cast %22 : vector<2x1xf32> to vector<2x1x1xf32>
    %cst_14 = arith.constant 2.000000e+00 : f32
    %24 = vector.broadcast %cst_14 : f32 to vector<2x1x1xf32>
    %25 = arith.divf %23, %24 : vector<2x1x1xf32>
    %26 = vector.broadcast %25 : vector<2x1x1xf32> to vector<2x1x2xf32>
    %27 = arith.subf %21, %26 : vector<2x1x2xf32>
    %28 = arith.mulf %27, %27 : vector<2x1x2xf32>
    %cst_15 = arith.constant dense<0.000000e+00> : vector<2x1xf32>
    %29 = vector.multi_reduction <add>, %28, %cst_15 [2] : vector<2x1x2xf32> to vector<2x1xf32>
    %30 = vector.shape_cast %29 : vector<2x1xf32> to vector<2x1x1xf32>
    %cst_16 = arith.constant 2.000000e+00 : f32
    %31 = vector.broadcast %cst_16 : f32 to vector<2x1x1xf32>
    %32 = arith.divf %30, %31 : vector<2x1x1xf32>
    %33 = vector.broadcast %25 : vector<2x1x1xf32> to vector<2x1x2xf32>
    %34 = arith.subf %21, %33 : vector<2x1x2xf32>
    %cst_17 = arith.constant 9.99999974E-6 : f32
    %35 = vector.broadcast %cst_17 : f32 to vector<2x1x1xf32>
    %36 = arith.addf %32, %35 : vector<2x1x1xf32>
    %37 = math.rsqrt %36 : vector<2x1x1xf32>
    %38 = vector.broadcast %37 : vector<2x1x1xf32> to vector<2x1x2xf32>
    %39 = arith.mulf %34, %38 : vector<2x1x2xf32>
    %c0_18 = arith.constant 0 : index
    %c0_19 = arith.constant 0 : index
    %c0_20 = arith.constant 0 : index
    %40 = vector.load %arg5[%c0_18, %c0_19, %c0_20] : memref<1x1x2xf32, #tpu.memory_space<vmem>>, vector<1x1x2xf32>
    %41 = vector.broadcast %40 : vector<1x1x2xf32> to vector<2x1x2xf32>
    %42 = arith.mulf %39, %41 : vector<2x1x2xf32>
    %c0_21 = arith.constant 0 : index
    %c0_22 = arith.constant 0 : index
    %c0_23 = arith.constant 0 : index
    %43 = vector.load %arg6[%c0_21, %c0_22, %c0_23] : memref<1x1x2xf32, #tpu.memory_space<vmem>>, vector<1x1x2xf32>
    %44 = vector.broadcast %43 : vector<1x1x2xf32> to vector<2x1x2xf32>
    %45 = arith.addf %42, %44 : vector<2x1x2xf32>
    %cst_24 = arith.constant 0.000000e+00 : f32
    %46 = vector.broadcast %cst_24 : f32 to vector<2x1x2xf32>
    %47 = arith.maximumf %45, %46 : vector<2x1x2xf32>
    %c0_25 = arith.constant 0 : index
    %c0_26 = arith.constant 0 : index
    %48 = vector.load %arg7[%c0_25, %c0_26] : memref<4x2xf32, #tpu.memory_space<vmem>>, vector<4x2xf32>
    "tpu.trace_start"() <{level = 10 : i32, message = "bop,cp->boc"}> : () -> ()
    %cst_27 = arith.constant dense<0.000000e+00> : vector<2x1x4xf32>
    %49 = tpu.matmul %47, %48, %cst_27 {dimension_numbers = #tpu.dot_dimension_numbers<[2], [1], [0, 1], [0], [0, 0, 0, 1, 1, 0], [], []>, precision = #tpu.contract_precision<fp32>} : vector<2x1x2xf32>, vector<4x2xf32>, vector<2x1x4xf32> -> vector<2x1x4xf32>
    "tpu.trace_stop"() : () -> ()
    %c0_28 = arith.constant 0 : index
    %c0_29 = arith.constant 0 : index
    %c0_30 = arith.constant 0 : index
    %50 = vector.load %arg8[%c0_28, %c0_29, %c0_30] : memref<1x1x4xf32, #tpu.memory_space<vmem>>, vector<1x1x4xf32>
    %51 = vector.broadcast %50 : vector<1x1x4xf32> to vector<2x1x4xf32>
    %52 = arith.addf %49, %51 : vector<2x1x4xf32>
    %53 = tpu.transpose %52, [0, 2, 1] : vector<2x1x4xf32> -> vector<2x4x1xf32>
    %54 = vector.broadcast %53 : vector<2x4x1xf32> to vector<2x4x256xf32>
    %55 = arith.addf %0, %54 : vector<2x4x256xf32>
    %c0_31 = arith.constant 0 : index
    %c0_32 = arith.constant 0 : index
    %c0_33 = arith.constant 0 : index
    %56 = vector.load %arg9[%c0_31, %c0_32, %c0_33] : memref<2x4x256xf32, #tpu.memory_space<vmem>>, vector<2x4x256xf32>
    tpu.vector_store %arg9[%c0_31, %c0_32, %c0_33], %55 {strides = array<i32>} : memref<2x4x256xf32, #tpu.memory_space<vmem>>, vector<2x4x256xf32>,
    return
  }
  func.func @transform_0(%arg0: i32) -> (i32, i32, i32) {
    %c0_i32 = arith.constant 0 : i32
    %c0_i32_0 = arith.constant 0 : i32
    %c0_i32_1 = arith.constant 0 : i32
    return %arg0, %c0_i32, %c0_i32_0 : i32, i32, i32
  }
  func.func @transform_1(%arg0: i32) -> (i32, i32) {
    %c0_i32 = arith.constant 0 : i32
    %c0_i32_0 = arith.constant 0 : i32
    %c0_i32_1 = arith.constant 0 : i32
    return %c0_i32, %c0_i32_0 : i32, i32
  }
  func.func @transform_2(%arg0: i32) -> (i32, i32) {
    %c0_i32 = arith.constant 0 : i32
    %c0_i32_0 = arith.constant 0 : i32
    %c0_i32_1 = arith.constant 0 : i32
    return %c0_i32, %c0_i32_0 : i32, i32
  }
  func.func @transform_3(%arg0: i32) -> (i32, i32, i32) {
    %c0_i32 = arith.constant 0 : i32
    %c0_i32_0 = arith.constant 0 : i32
    %c0_i32_1 = arith.constant 0 : i32
    %c0_i32_2 = arith.constant 0 : i32
    return %c0_i32, %c0_i32_0, %c0_i32_1 : i32, i32, i32
  }
  func.func @transform_4(%arg0: i32) -> (i32, i32, i32) {
    %c0_i32 = arith.constant 0 : i32
    %c0_i32_0 = arith.constant 0 : i32
    %c0_i32_1 = arith.constant 0 : i32
    %c0_i32_2 = arith.constant 0 : i32
    return %c0_i32, %c0_i32_0, %c0_i32_1 : i32, i32, i32
  }
  func.func @transform_5(%arg0: i32) -> (i32, i32, i32) {
    %c0_i32 = arith.constant 0 : i32
    %c0_i32_0 = arith.constant 0 : i32
    %c0_i32_1 = arith.constant 0 : i32
    %c0_i32_2 = arith.constant 0 : i32
    return %c0_i32, %c0_i32_0, %c0_i32_1 : i32, i32, i32
  }
  func.func @transform_6(%arg0: i32) -> (i32, i32) {
    %c0_i32 = arith.constant 0 : i32
    %c0_i32_0 = arith.constant 0 : i32
    %c0_i32_1 = arith.constant 0 : i32
    return %c0_i32, %c0_i32_0 : i32, i32
  }
  func.func @transform_7(%arg0: i32) -> (i32, i32, i32) {
    %c0_i32 = arith.constant 0 : i32
    %c0_i32_0 = arith.constant 0 : i32
    %c0_i32_1 = arith.constant 0 : i32
    %c0_i32_2 = arith.constant 0 : i32
    return %c0_i32, %c0_i32_0, %c0_i32_1 : i32, i32, i32
  }
  func.func @transform_8(%arg0: i32) -> (i32, i32, i32) {
    %c0_i32 = arith.constant 0 : i32
    %c0_i32_0 = arith.constant 0 : i32
    %c0_i32_1 = arith.constant 0 : i32
    return %arg0, %c0_i32, %c0_i32_0 : i32, i32, i32
  }
}

</mosaic_0001>

<bundles_post_ra>
// kernel: _context_block_impl.1
= control target key start
LH: loop header
LB: loop body
LE: loop exit
PB: predicated region body
PF: predicated region fallthrough
CT: control target
= control target key end

     0   :  { %vm36_vm0 = vcmask 31744   ;;  %vm40_vm1 = vcmask 1043456   ;;  %vm637_vm2 = vcmask 1040384   ;;  %vm1299_vm11 = vcmask 1041409   ;;  %s1993_s0 = inlined_call_operand.vmem [shape: f32[2,4,256], index: 0, kind: input, shape index: {}, may-alias: {0,8}]   ;;  %s1994_s1 = inlined_call_operand.vmem [shape: f32[1,4], index: 1, kind: input, shape index: {}]   ;;  %s1995_s2 = inlined_call_operand.vmem [shape: f32[2,4], index: 2, kind: input, shape index: {}]   ;;  %s1996_s3 = inlined_call_operand.vmem [shape: f32[1,1,2], index: 3, kind: input, shape index: {}]   ;;  %s1997_s6 = inlined_call_operand.vmem [shape: f32[4,2], index: 6, kind: input, shape index: {}]   ;;  %s1998_s4 = inlined_call_operand.vmem [shape: f32[1,1,2], index: 4, kind: input, shape index: {}]   ;;  %s1999_s5 = inlined_call_operand.vmem [shape: f32[1,1,2], index: 5, kind: input, shape index: {}]   ;;  %s2000_s7 = inlined_call_operand.vmem [shape: f32[1,1,4], index: 7, kind: input, shape index: {}]   ;;  %s2001_s8 = inlined_call_operand.vmem [shape: f32[2,4,256], index: 8, kind: output, shape index: {}, may-alias: {0,8}]  }
   0x1   :  { %v1855_v0 = vld [vmem:[%s1993_s0] sm:$0xff]  ;;  %v1873_v6 = vld [vmem:[%s1993_s0 + $0x8] sm:$0xff]  ;;  %vm1461_vm12 = vcmask 8192   ;;  %vm1535_vm14 = vcmask 15360  }
   0x2   :  { %v31_v1 = vld [vmem:[%s1994_s1] sm:$0x1]  ;;  %33 = vst [vmem:[#allocation1] ss:$2 sm:$0xff] %v1855_v0 }
   0x3   :  { %v38_v2 = vsel %vm36_vm0, %v31_v1, 0 }
   0x4   :  { %v1862_v3 = vand.u32 4294901760, %v38_v2 }
   0x6   :  { %v1865_v4 = vsub.f32 %v38_v2, %v1862_v3 }
   0x8   :  { %v1868_v5 = vand.u32 4294901760, %v1865_v4 }
   0x9   :  { %v34_v7 = vld.sshfl [vmem:[#allocation1] sm:$0xff pattern:$0x75316420]  ;;  %v35_v9 = vld.sshfl [vmem:[#allocation1 + $0x8] sm:$0xff pattern:$0x75316420] }
   0xa   :  { %v65_v8 = vsub.f32 %v1865_v4, %v1868_v5  ;;  %v41_v10 = vsel %vm40_vm1, %v34_v7, 0  ;;  %v43_v11 = vsel %vm40_vm1, %v35_v9, 0  ;;  %338 = vst [vmem:[#allocation1] ss:$2 sm:$0xff] %v1873_v6 }
   0xb   :  { %v60_v12 = vand.u32 4294901760, %v41_v10  ;;  %v206_v14 = vand.u32 4294901760, %v43_v11 }
   0xc   :  { %v1880_v13 = vand.u32 4294901760, %v65_v8 }
   0xd   :  { %v87_v15 = vsub.f32 %v41_v10, %v60_v12  ;;  %61 = vmatpush.msra.mxu0 %v60_v12  ;;  %137 = vmatpush.msra.mxu3 %v60_v12  ;;  %v233_v16 = vsub.f32 %v43_v11, %v206_v14 }
   0xe   :  { %67 = vmatmul.f32.vlgmr.msra.gmra.mxu0 %v1880_v13  ;;  %141 = vmatmul.f32.vlgmr.msra.gmra.mxu3 %v1868_v5 }
   0xf   :  { %114 = vmatpush.msra.mxu2 %v87_v15  ;;  %v88_v17 = vand.u32 4294901760, %v87_v15  ;;  %v234_v18 = vand.u32 4294901760, %v233_v16 }
  0x10   :  { %117 = vmatmul.f32.vlgmr.msra.gmra.mxu2 %v1865_v4 }
  0x11   :  { %207 = vmatpush.msrb.mxu2 %v206_v14  ;;  %v89_v19 = vsub.f32 %v87_v15, %v88_v17  ;;  %163 = vmatpush.msrb.mxu0 %v88_v17  ;;  %v235_v20 = vsub.f32 %v233_v16, %v234_v18  ;;  %v339_v21 = vld.sshfl [vmem:[#allocation1] sm:$0xff pattern:$0x75316420]  ;;  %v340_v22 = vld.sshfl [vmem:[#allocation1 + $0x8] sm:$0xff pattern:$0x75316420] }
  0x12   :  { %v341_v23 = vsel %vm40_vm1, %v339_v21, 0  ;;  %v343_v24 = vsel %vm40_vm1, %v340_v22, 0  ;;  %670 = vst [vmem:[#allocation1] ss:$2 sm:$0xff] %v1855_v0 }
  0x13   :  { %309 = vmatpush.msra.mxu2 %v234_v18  ;;  %260 = vmatpush.msra.mxu0 %v233_v16  ;;  %v90_v25 = vand.u32 4294901760, %v89_v19  ;;  %v236_v26 = vand.u32 4294901760, %v235_v20  ;;  %v360_v27 = vand.u32 4294901760, %v341_v23  ;;  %v506_v28 = vand.u32 4294901760, %v343_v24 }
  0x15   :  { %91 = vmatpush.msra.mxu1 %v90_v25  ;;  %237 = vmatpush.msrb.mxu3 %v236_v26  ;;  %v387_v29 = vsub.f32 %v341_v23, %v360_v27  ;;  %v533_v30 = vsub.f32 %v343_v24, %v506_v28 }
  0x16   :  { %93 = vmatmul.f32.vlgmr.msra.gmra.mxu1 %v1862_v3  ;;  %165 = vmatmul.f32.vlgmr.msrb.gmra.mxu0 %v1862_v3 }
  0x17   :  { %185 = vmatpush.msrb.mxu1 %v60_v12  ;;  %239 = vmatmul.f32.vlgmr.msrb.gmra.mxu3 %v1862_v3  ;;  %v388_v31 = vand.u32 4294901760, %v387_v29  ;;  %v534_v32 = vand.u32 4294901760, %v533_v30 }
  0x18   :  { %213 = vmatmul.f32.vlgmr.msrb.gmra.mxu2 %v1880_v13  ;;  %331 = vmatpush.msra.mxu3 %v206_v14 }
  0x19   :  { %283 = vmatpush.msra.mxu1 %v206_v14  ;;  %414 = vmatpush.msrb.mxu2 %v387_v29  ;;  %v389_v33 = vsub.f32 %v387_v29, %v388_v31  ;;  %v535_v34 = vsub.f32 %v533_v30, %v534_v32  ;;  %v671_v25 = vld.sshfl [vmem:[#allocation1] sm:$0xff pattern:$0x75316420] }
  0x1a   :  { %361 = vmatpush.msrb.mxu0 %v360_v27  ;;  %437 = vmatpush.msrb.mxu3 %v360_v27  ;;  %v690_v26 = vand.u32 4294901760, %v671_v25 }
  0x1b   :  { %v390_v35 = vand.u32 4294901760, %v389_v33  ;;  %v536_v36 = vand.u32 4294901760, %v535_v34 }
  0x1e   :  { %187 = vmatmul.f32.vlgmr.msrb.gmra.mxu1 %v1862_v3  ;;  %263 = vmatmul.f32.vlgmr.msra.gmra.mxu0 %v1865_v4 }
  0x1f   :  { %333 = vmatmul.f32.vlgmr.msra.gmra.mxu3 %v1862_v3  ;;  %391 = vmatpush.msrb.mxu1 %v390_v35 }
  0x20   :  { %311 = vmatmul.f32.vlgmr.msra.gmra.mxu2 %v1862_v3  ;;  %463 = vmatpush.msra.mxu0 %v388_v31  ;;  %v672_v31 = vld.sshfl [vmem:[#allocation1 + $0x8] sm:$0xff pattern:$0x75316420] }
  0x21   :  { %507 = vmatpush.msra.mxu2 %v506_v28  ;;  %537 = vmatpush.msra.mxu3 %v536_v36  ;;  %967 = vst [vmem:[#allocation1] ss:$2 sm:$0xff] %v1873_v6 }
  0x26   :  { %287 = vmatmul.f32.vlgmr.msra.gmra.mxu1 %v1868_v5  ;;  %367 = vmatmul.f32.vlgmr.msrb.gmra.mxu0 %v1880_v13 }
  0x27   :  { %441 = vmatmul.f32.vlgmr.msrb.gmra.mxu3 %v1868_v5  ;;  %485 = vmatpush.msra.mxu1 %v360_v27  ;;  %v717_v27 = vsub.f32 %v671_v25, %v690_v26 }
  0x28   :  { %417 = vmatmul.f32.vlgmr.msrb.gmra.mxu2 %v1865_v4  ;;  %560 = vmatpush.msrb.mxu0 %v533_v30 }
  0x29   :  { %609 = vmatpush.msrb.mxu2 %v534_v32  ;;  %631 = vmatpush.msrb.mxu3 %v506_v28  ;;  %v836_v32 = vand.u32 4294901760, %v672_v31 }
  0x2b   :  { %v863_v33 = vsub.f32 %v672_v31, %v836_v32 }
  0x2d   :  { %v864_v34 = vand.u32 4294901760, %v863_v33 }
  0x2e   :  { %393 = vmatmul.f32.vlgmr.msrb.gmra.mxu1 %v1862_v3  ;;  %465 = vmatmul.f32.vlgmr.msra.gmra.mxu0 %v1862_v3 }
  0x2f   :  { %539 = vmatmul.f32.vlgmr.msra.gmra.mxu3 %v1862_v3  ;;  %583 = vmatpush.msrb.mxu1 %v506_v28  ;;  %v718_v28 = vand.u32 4294901760, %v717_v27  ;;  %v865_v35 = vsub.f32 %v863_v33, %v864_v34 }
  0x30   :  { %513 = vmatmul.f32.vlgmr.msra.gmra.mxu2 %v1880_v13  ;;  %691 = vmatpush.xpose.msra.mxu0 %v690_v26 }
  0x31   :  { %767 = vmatpush.xpose.msra.mxu3 %v690_v26  ;;  %744 = vmatpush.xpose.msra.mxu2 %v717_v27  ;;  %v719_v29 = vsub.f32 %v717_v27, %v718_v28  ;;  %v866_v36 = vand.u32 4294901760, %v865_v35 }
  0x33   :  { %v720_v30 = vand.u32 4294901760, %v719_v29 }
  0x36   :  { %487 = vmatmul.f32.vlgmr.msra.gmra.mxu1 %v1862_v3  ;;  %563 = vmatmul.f32.vlgmr.msrb.gmra.mxu0 %v1865_v4 }
  0x37   :  { %633 = vmatmul.f32.vlgmr.msrb.gmra.mxu3 %v1862_v3  ;;  %793 = vmatpush.xpose.msrb.mxu0 %v718_v28 }
  0x38   :  { %611 = vmatmul.f32.vlgmr.msrb.gmra.mxu2 %v1862_v3  ;;  %721 = vmatpush.xpose.msra.mxu1 %v720_v30 }
  0x39   :  { %837 = vmatpush.xpose.msrb.mxu2 %v836_v32  ;;  %867 = vmatpush.xpose.msrb.mxu3 %v866_v36 }
  0x3e   :  { %587 = vmatmul.f32.vlgmr.msrb.gmra.mxu1 %v1868_v5 }
  0x3f   :  { %815 = vmatpush.xpose.msrb.mxu1 %v690_v26 }
  0x8b   :  { %v68_v37 = vpop.f32.mrf.mxu0 }
  0x91   :  { %v142_v38 = vpop.f32.mrf.mxu3 }
  0x93   :  { %v94_v39 = vpop.f32.mrf.mxu1  ;;  %v118_v40 = vpop.f32.mrf.mxu2 }
  0x94   :  { %v166_v41 = vpop.f32.mrf.mxu0  ;;  %v95_v42 = vadd.f32 %v94_v39, %v68_v37 }
  0x96   :  { %v119_v43 = vadd.f32 %v118_v40, %v95_v42 }
  0x98   :  { %v143_v48 = vadd.f32 %v142_v38, %v119_v43  ;;  %v968_v38 = vld.sshfl [vmem:[#allocation1] sm:$0xff pattern:$0x75316420] }
  0x99   :  { %v987_v43 = vand.u32 4294901760, %v968_v38 }
  0x9a   :  { %v240_v44 = vpop.f32.mrf.mxu3  ;;  %v167_v50 = vadd.f32 %v166_v41, %v143_v48 }
  0x9b   :  { %v188_v45 = vpop.f32.mrf.mxu1  ;;  %v214_v46 = vpop.f32.mrf.mxu2 }
  0x9c   :  { %v264_v47 = vpop.f32.mrf.mxu0  ;;  %v241_v49 = vadd.f32 %v240_v44, %v214_v46  ;;  %v189_v57 = vadd.f32 %v188_v45, %v167_v50  ;;  %v1014_v44 = vsub.f32 %v968_v38, %v987_v43  ;;  %v1294_v38 = vld [vmem:[%s1995_s2] sm:$0x3] }
  0x9e   :  { %v265_v51 = vadd.f32 %v264_v47, %v241_v49  ;;  %v638_v60 = vsel %vm637_vm2, %v189_v57, -inf  ;;  %v1015_v46 = vand.u32 4294901760, %v1014_v44  ;;  %v969_v49 = vld.sshfl [vmem:[#allocation1 + $0x8] sm:$0xff pattern:$0x75316420] }
  0xa2   :  { %v334_v52 = vpop.f32.mrf.mxu3 }
  0xa3   :  { %v288_v53 = vpop.f32.mrf.mxu1  ;;  %v312_v54 = vpop.f32.mrf.mxu2 }
  0xa4   :  { %v289_v55 = vadd.f32 %v288_v53, %v265_v51  ;;  %v368_v56 = vpop.f32.mrf.mxu0  ;;  %v1016_v53 = vsub.f32 %v1014_v44, %v1015_v46 }
  0xa6   :  { %v313_v58 = vadd.f32 %v312_v54, %v289_v55  ;;  %v1133_v54 = vand.u32 4294901760, %v969_v49 }
  0xa8   :  { %v335_v59 = vadd.f32 %v334_v52, %v313_v58 }
  0xaa   :  { %v639_v61 = vsel %vm637_vm2, %v335_v59, -inf  ;;  %v442_v62 = vpop.f32.mrf.mxu3 }
  0xab   :  { %v394_v63 = vpop.f32.mrf.mxu1  ;;  %v418_v1 = vpop.f32.mrf.mxu2  ;;  %v640_v2 = vmax.f32 %v638_v60, %v639_v61  ;;  %v1160_v60 = vsub.f32 %v969_v49, %v1133_v54 }
  0xac   :  { %v466_v3 = vpop.f32.mrf.mxu0  ;;  %v395_v4 = vadd.f32 %v394_v63, %v368_v56 }
  0xad   :  { %641 = vmax.xlane.f32.xlu0 %v640_v2  ;;  %v1161_v63 = vand.u32 4294901760, %v1160_v60 }
  0xae   :  { %v419_v5 = vadd.f32 %v418_v1, %v395_v4 }
  0xb0   :  { %v443_v10 = vadd.f32 %v442_v62, %v419_v5 }
  0xb2   :  { %v540_v7 = vpop.f32.mrf.mxu3  ;;  %v467_v13 = vadd.f32 %v466_v3, %v443_v10 }
  0xb3   :  { %v488_v8 = vpop.f32.mrf.mxu1  ;;  %v514_v9 = vpop.f32.mrf.mxu2 }
  0xb4   :  { %v541_v11 = vadd.f32 %v540_v7, %v514_v9  ;;  %v564_v12 = vpop.f32.mrf.mxu0  ;;  %v1911_v19 = vadd.f32 %v488_v8, %v467_v13  ;;  %v1162_v7 = vsub.f32 %v1160_v60, %v1161_v63 }
  0xb6   :  { %v565_v14 = vadd.f32 %v564_v12, %v541_v11  ;;  %v643_v22 = vsel %vm637_vm2, %v1911_v19, -inf  ;;  %v1163_v8 = vand.u32 4294901760, %v1162_v7 }
  0xba   :  { %v634_v18 = vpop.f32.mrf.mxu3 }
  0xbb   :  { %v588_v15 = vpop.f32.mrf.mxu1  ;;  %v612_v16 = vpop.f32.mrf.mxu2 }
  0xbc   :  { %v589_v17 = vadd.f32 %v588_v15, %v565_v14 }
  0xbe   :  { %v613_v20 = vadd.f32 %v612_v16, %v589_v17 }
  0xc0   :  { %v1913_v21 = vadd.f32 %v634_v18, %v613_v20 }
  0xc2   :  { %v644_v23 = vsel %vm637_vm2, %v1913_v21, -inf }
  0xc3   :  { %v645_v24 = vmax.f32 %v643_v22, %v644_v23 }
  0xc5   :  { %646 = vmax.xlane.f32.xlu0 %v645_v24 }
 0x120   :  { %v642_v37 = vpop.xlane.xlu0 %641 }
 0x121   :  { %v648_v39 = vsub.f32 %v189_v57, %v642_v37  ;;  %v649_v40 = vsub.f32 %v335_v59, %v642_v37  ;;  %v1017_v59 = vand.u32 4294901760, %v1016_v53 }
 0x123   :  { %v652_v41 = vmul.f32 1.442695, %v648_v39  ;;  %v654_v42 = vmul.f32 1.442695, %v649_v40  ;;  %v1310_v39 = vsel %vm36_vm0, %v1294_v38, 0 }
 0x125   :  { %1786 = vpow2.f32 %v652_v41  ;;  %v1327_v41 = vand.u32 4294901760, %v1310_v39 }
 0x126   :  { %1788 = vpow2.f32 %v654_v42 }
 0x12b   :  { %v1920_v45 = vpop.eup %1786 }
 0x12c   :  { %v1922_v47 = vpop.eup %1788  ;;  %v692_v48 = vand.u32 4294901760, %v1920_v45 }
 0x12d   :  { %v838_v50 = vand.u32 4294901760, %v1922_v47  ;;  %v661_v22 = vsel %vm637_vm2, %v1922_v47, 0.0 }
 0x12e   :  { %723 = vmatmul.f32.vlgmr.msra.gmra.mxu1 %v692_v48  ;;  %v693_v51 = vsub.f32 %v1920_v45, %v692_v48 }
 0x12f   :  { %v839_v52 = vsub.f32 %v1922_v47, %v838_v50  ;;  %913 = vmatpush.xpose.msra.mxu1 %v836_v32 }
 0x130   :  { %747 = vmatmul.f32.vlgmr.msra.gmra.mxu2 %v693_v51  ;;  %v694_v55 = vand.u32 4294901760, %v693_v51 }
 0x131   :  { %v840_v56 = vand.u32 4294901760, %v839_v52  ;;  %939 = vmatpush.xpose.msra.mxu2 %v864_v34 }
 0x132   :  { %771 = vmatmul.f32.vlgmr.msra.gmra.mxu3 %v694_v55  ;;  %v695_v57 = vsub.f32 %v693_v51, %v694_v55 }
 0x133   :  { %v841_v58 = vsub.f32 %v839_v52, %v840_v56  ;;  %961 = vmatpush.xpose.msra.mxu3 %v836_v32 }
 0x134   :  { %v696_v61 = vand.u32 4294901760, %v695_v57 }
 0x135   :  { %v842_v62 = vand.u32 4294901760, %v841_v58 }
 0x136   :  { %697 = vmatmul.f32.vlgmr.msra.gmra.mxu0 %v696_v61  ;;  %817 = vmatmul.f32.vlgmr.msrb.gmra.mxu1 %v692_v48 }
 0x137   :  { %890 = vmatpush.xpose.msra.mxu0 %v863_v33  ;;  %1018 = vmatpush.xpose.msrb.mxu1 %v1017_v59 }
 0x138   :  { %843 = vmatmul.f32.vlgmr.msrb.gmra.mxu2 %v842_v62  ;;  %v647_v1 = vpop.xlane.xlu0 %646 }
 0x139   :  { %v650_v2 = vsub.f32 %v1911_v19, %v647_v1  ;;  %v651_v3 = vsub.f32 %v1913_v21, %v647_v1  ;;  %1041 = vmatpush.xpose.msrb.mxu2 %v1014_v44  ;;  %v660_v21 = vsel %vm637_vm2, %v1920_v45, 0.0 }
 0x13a   :  { %869 = vmatmul.f32.vlgmr.msrb.gmra.mxu3 %v838_v50  ;;  %v662_v25 = vadd.f32 %v661_v22, %v660_v21 }
 0x13b   :  { %v656_v4 = vmul.f32 1.442695, %v650_v2  ;;  %v658_v5 = vmul.f32 1.442695, %v651_v3  ;;  %1064 = vmatpush.xpose.msrb.mxu3 %v987_v43 }
 0x13d   :  { %1790 = vpow2.f32 %v656_v4 }
 0x13e   :  { %1792 = vpow2.f32 %v658_v5  ;;  %795 = vmatmul.f32.vlgmr.msrb.gmra.mxu0 %v692_v48  ;;  %917 = vmatmul.f32.vlgmr.msra.gmra.mxu1 %v840_v56 }
 0x13f   :  { %988 = vmatpush.xpose.msrb.mxu0 %v987_v43  ;;  %1112 = vmatpush.xpose.msra.mxu1 %v987_v43  ;;  %v1354_v43 = vsub.f32 %v1310_v39, %v1327_v41 }
 0x140   :  { %941 = vmatmul.f32.vlgmr.msra.gmra.mxu2 %v838_v50 }
 0x141   :  { %1134 = vmatpush.xpose.msra.mxu2 %v1133_v54  ;;  %v1355_v48 = vand.u32 4294901760, %v1354_v43 }
 0x142   :  { %963 = vmatmul.f32.vlgmr.msra.gmra.mxu3 %v838_v50 }
 0x143   :  { %v1791_v9 = vpop.eup %1790  ;;  %1164 = vmatpush.xpose.msra.mxu3 %v1163_v8  ;;  %v1356_v50 = vsub.f32 %v1354_v43, %v1355_v48 }
 0x144   :  { %v1793_v10 = vpop.eup %1792  ;;  %v989_v11 = vand.u32 4294901760, %v1791_v9  ;;  %v665_v12 = vsel %vm637_vm2, %v1791_v9, 0.0 }
 0x145   :  { %v1135_v13 = vand.u32 4294901760, %v1793_v10  ;;  %v666_v14 = vsel %vm637_vm2, %v1793_v10, 0.0 }
 0x146   :  { %893 = vmatmul.f32.vlgmr.msra.gmra.mxu0 %v839_v52  ;;  %1020 = vmatmul.f32.vlgmr.msrb.gmra.mxu1 %v989_v11  ;;  %v667_v15 = vadd.f32 %v666_v14, %v665_v12  ;;  %v990_v16 = vsub.f32 %v1791_v9, %v989_v11  ;;  %v1357_v52 = vand.u32 4294901760, %v1356_v50 }
 0x147   :  { %1090 = vmatpush.xpose.msra.mxu0 %v1015_v46  ;;  %v1136_v17 = vsub.f32 %v1793_v10, %v1135_v13  ;;  %1210 = vmatpush.xpose.msrb.mxu1 %v1133_v54 }
 0x148   :  { %668 = vadd.xlane.f32.xlu1 %v667_v15  ;;  %1044 = vmatmul.f32.vlgmr.msrb.gmra.mxu2 %v990_v16  ;;  %v991_v18 = vand.u32 4294901760, %v990_v16 }
 0x149   :  { %v1137_v19 = vand.u32 4294901760, %v1136_v17  ;;  %1236 = vmatpush.xpose.msrb.mxu2 %v1161_v63 }
 0x14a   :  { %1068 = vmatmul.f32.vlgmr.msrb.gmra.mxu3 %v991_v18  ;;  %v992_v20 = vsub.f32 %v990_v16, %v991_v18 }
 0x14b   :  { %v1138_v23 = vsub.f32 %v1136_v17, %v1137_v19  ;;  %1258 = vmatpush.xpose.msrb.mxu3 %v1133_v54 }
 0x14c   :  { %v993_v24 = vand.u32 4294901760, %v992_v20 }
 0x14d   :  { %v1139_v26 = vand.u32 4294901760, %v1138_v23 }
 0x14e   :  { %994 = vmatmul.f32.vlgmr.msrb.gmra.mxu0 %v993_v24  ;;  %1114 = vmatmul.f32.vlgmr.msra.gmra.mxu1 %v989_v11 }
 0x14f   :  { %1187 = vmatpush.xpose.msrb.mxu0 %v1160_v60  ;;  %1358 = vmatpush.xpose.msra.mxu1 %v1357_v52 }
 0x150   :  { %663 = vadd.xlane.f32.xlu1 %v662_v25  ;;  %1140 = vmatmul.f32.vlgmr.msra.gmra.mxu2 %v1139_v26 }
 0x151   :  { %1381 = vmatpush.xpose.msra.mxu2 %v1354_v43 }
 0x152   :  { %1166 = vmatmul.f32.vlgmr.msra.gmra.mxu3 %v1135_v13 }
 0x153   :  { %1404 = vmatpush.xpose.msra.mxu3 %v1327_v41 }
 0x156   :  { %1092 = vmatmul.f32.vlgmr.msra.gmra.mxu0 %v989_v11  ;;  %1214 = vmatmul.f32.vlgmr.msrb.gmra.mxu1 %v1137_v19 }
 0x157   :  { %1328 = vmatpush.xpose.msra.mxu0 %v1327_v41  ;;  %1452 = vmatpush.xpose.msrb.mxu1 %v1327_v41 }
 0x158   :  { %1238 = vmatmul.f32.vlgmr.msrb.gmra.mxu2 %v1135_v13 }
 0x15a   :  { %1260 = vmatmul.f32.vlgmr.msrb.gmra.mxu3 %v1135_v13 }
 0x15e   :  { %1190 = vmatmul.f32.vlgmr.msrb.gmra.mxu0 %v1136_v17 }
 0x15f   :  { %1430 = vmatpush.xpose.msrb.mxu0 %v1355_v48 }
 0x1ab   :  { %v724_v27 = vpop.f32.mrf.mxu1 }
 0x1b3   :  { %v698_v28 = vpop.f32.mrf.mxu0  ;;  %v748_v29 = vpop.f32.mrf.mxu2 }
 0x1b4   :  { %v818_v30 = vpop.f32.mrf.mxu1  ;;  %v725_v35 = vadd.f32 %v724_v27, %v698_v28 }
 0x1b5   :  { %v772_v31 = vpop.f32.mrf.mxu3 }
 0x1b6   :  { %v749_v40 = vadd.f32 %v748_v29, %v725_v35 }
 0x1b8   :  { %v773_v46 = vadd.f32 %v772_v31, %v749_v40 }
 0x1bb   :  { %v1936_v32 = vpop.xlane.xlu1 %668  ;;  %v796_v33 = vpop.f32.mrf.mxu0 }
 0x1bc   :  { %v844_v34 = vpop.f32.mrf.mxu2  ;;  %v918_v37 = vpop.f32.mrf.mxu1  ;;  %1794 = vrcp.f32 %v1936_v32  ;;  %v797_v49 = vadd.f32 %v796_v33, %v773_v46  ;;  %vm1283_vm5 = vweird.f32 %v1936_v32  ;;  %v1289_v24 = vand.u32 2147483648, %v1936_v32 }
 0x1bd   :  { %v870_v36 = vpop.f32.mrf.mxu3  ;;  %v1287_v28 = vand.u32 2147483647, %v1936_v32 }
 0x1be   :  { %v819_v53 = vadd.f32 %v818_v30, %v797_v49 }
 0x1bf   :  { %vm1288_vm10 = vcmp.eq.f32.partialorder %v1287_v28, 8.507059e+37 }
 0x1c0   :  { %v845_v61 = vadd.f32 %v844_v34, %v819_v53 }
 0x1c2   :  { %v1795_v55 = vpop.eup %1794  ;;  %v871_v2 = vadd.f32 %v870_v36, %v845_v61 }
 0x1c3   :  { %v894_v42 = vpop.f32.mrf.mxu0  ;;  %v1942_v44 = vpop.xlane.xlu1 %663  ;;  %v1279_v62 = vmul.f32 %v1795_v55, %v1936_v32  ;;  %vm1284_vm3 = vweird.f32 %v1795_v55 }
 0x1c4   :  { %v942_v45 = vpop.f32.mrf.mxu2  ;;  %1796 = vrcp.f32 %v1942_v44  ;;  %v1021_v51 = vpop.f32.mrf.mxu1  ;;  %v895_v11 = vadd.f32 %v894_v42, %v871_v2  ;;  %v1275_v22 = vand.u32 2147483648, %v1942_v44  ;;  %vm1269_vm6 = vweird.f32 %v1942_v44  ;;  %vm1955_vm7 = vmor %vm1283_vm5, %vm1284_vm3 }
 0x1c5   :  { %v1944_v47 = vpop.f32.mrf.mxu3  ;;  %v1280_v5 = vsub.f32 1.0, %v1279_v62  ;;  %v1273_v25 = vand.u32 2147483647, %v1942_v44 }
 0x1c6   :  { %v919_v17 = vadd.f32 %v918_v37, %v895_v11  ;;  %v1276_v35 = vor.u32 1.1754944e-38, %v1275_v22  ;;  %v1290_v37 = vor.u32 1.1754944e-38, %v1289_v24 }
 0x1c7   :  { %v1281_v13 = vmul.f32 %v1795_v55, %v1280_v5  ;;  %vm1274_vm9 = vcmp.eq.f32.partialorder %v1273_v25, 8.507059e+37  ;;  %v1804_v5 = vmov 2.0  }
 0x1c8   :  { %v943_v30 = vadd.f32 %v942_v45, %v919_v17  ;;  %1798 = vrcp.f32 %v1804_v5  ;;  %v1805_v5 = vmov 0  }
 0x1c9   :  { %v1282_v21 = vadd.f32 %v1795_v55, %v1281_v13  ;;  %1784 = vset.pattern.permute.xlu1 %v1805_v5 }
 0x1ca   :  { %v1797_v58 = vpop.eup %1796  ;;  %v965_v41 = vadd.f32 %v1944_v47, %v943_v30  ;;  %v1295_v47 = vld [vmem:[%s1996_s3] sm:$0x1] }
 0x1cb   :  { %v995_v54 = vpop.f32.mrf.mxu0  ;;  %v1265_v63 = vmul.f32 %v1797_v58, %v1942_v44  ;;  %vm1270_vm4 = vweird.f32 %v1797_v58  ;;  %v1286_v34 = vsel %vm1955_vm7, %v1795_v55, %v1282_v21  ;;  %1302 = vst [vmem:[#allocation1] ss:$9 sm:$0xff] %v1295_v47 }
 0x1cc   :  { %v1022_v56 = vadd.f32 %v1021_v51, %v995_v54  ;;  %v1045_v57 = vpop.f32.mrf.mxu2  ;;  %v1115_v3 = vpop.f32.mrf.mxu1  ;;  %vm1271_vm8 = vmor %vm1269_vm6, %vm1270_vm4  ;;  %v1291_v40 = vsel %vm1288_vm10, %v1290_v37, %v1286_v34  ;;  %1304 = vst [vmem:[#allocation1 + $0x1] ss:$9 sm:$0xff] %v1295_v47 }
 0x1cd   :  { %v1069_v59 = vpop.f32.mrf.mxu3  ;;  %v1266_v7 = vsub.f32 1.0, %v1265_v63 }
 0x1ce   :  { %v1046_v60 = vadd.f32 %v1045_v57, %v1022_v56 }
 0x1cf   :  { %v1267_v14 = vmul.f32 %v1797_v58, %v1266_v7  ;;  %v1799_v7 = vpop.eup %1798 }
 0x1d0   :  { %v1070_v1 = vadd.f32 %v1069_v59, %v1046_v60  ;;  %vm1473_vm13 = vweird.f32 %v1799_v7 }
 0x1d1   :  { %v1268_v19 = vadd.f32 %v1797_v58, %v1267_v14 }
 0x1d3   :  { %v1093_v4 = vpop.f32.mrf.mxu0  ;;  %v1272_v31 = vsel %vm1271_vm8, %v1797_v58, %v1268_v19  ;;  %v1305_v52 = vld [vmem:[#allocation1] sm:$0xff] }
 0x1d4   :  { %v1094_v8 = vadd.f32 %v1093_v4, %v1070_v1  ;;  %v1141_v9 = vpop.f32.mrf.mxu2  ;;  %v1215_v23 = vpop.f32.mrf.mxu1  ;;  %v1277_v39 = vsel %vm1274_vm9, %v1276_v35, %v1272_v31 }
 0x1d5   :  { %v1167_v12 = vpop.f32.mrf.mxu3  ;;  %v1292_v32 = vmul.f32 %v1277_v39, %v965_v41 }
 0x1d6   :  { %v1116_v10 = vadd.f32 %v1115_v3, %v1094_v8  ;;  %v1469_v8 = vmul.f32 2.0, %v1799_v7 }
 0x1d8   :  { %v1142_v15 = vadd.f32 %v1141_v9, %v1116_v10  ;;  %v1470_v9 = vsub.f32 1.0, %v1469_v8 }
 0x1da   :  { %v1168_v16 = vadd.f32 %v1167_v12, %v1142_v15  ;;  %v1471_v10 = vmul.f32 %v1799_v7, %v1470_v9 }
 0x1db   :  { %v1191_v18 = vpop.f32.mrf.mxu0 }
 0x1dc   :  { %v1192_v20 = vadd.f32 %v1191_v18, %v1168_v16  ;;  %v1239_v29 = vpop.f32.mrf.mxu2  ;;  %v1472_v11 = vadd.f32 %v1799_v7, %v1471_v10 }
 0x1dd   :  { %v1261_v36 = vpop.f32.mrf.mxu3 }
 0x1de   :  { %v1216_v26 = vadd.f32 %v1215_v23, %v1192_v20  ;;  %v1474_v12 = vsel %vm1473_vm13, %v1799_v7, %v1472_v11 }
 0x1e0   :  { %v1240_v33 = vadd.f32 %v1239_v29, %v1216_v26  ;;  %v1521_v26 = vld [vmem:[%s1997_s6] sm:$0xf] }
 0x1e1   :  { %v1539_v27 = vsel %vm1535_vm14, %v1521_v26, 0 }
 0x1e2   :  { %v1262_v38 = vadd.f32 %v1261_v36, %v1240_v33  ;;  %v1556_v28 = vand.u32 4294901760, %v1539_v27 }
 0x1e4   :  { %v1293_v42 = vmul.f32 %v1291_v40, %v1262_v38  ;;  %v1583_v31 = vsub.f32 %v1539_v27, %v1556_v28  ;;  %1557 = vmatpush.xpose.msrb.mxu2 %v1556_v28 }
 0x1e6   :  { %v1298_v43 = vrot.slane %v1293_v42, 7  ;;  %v1584_v35 = vand.u32 4294901760, %v1583_v31 }
 0x1e8   :  { %v1300_v44 = vsel %vm1299_vm11, %v1298_v43, %v1292_v32  ;;  %v1585_v37 = vsub.f32 %v1583_v31, %v1584_v35 }
 0x1e9   :  { %v1307_v45 = vsel %vm36_vm0, %v1300_v44, 0  ;;  %v1513_v44 = vld [vmem:[%s1998_s4] sm:$0x1] }
 0x1ea   :  { %v1329_v46 = vand.u32 4294901760, %v1307_v45  ;;  %v1586_v39 = vand.u32 4294901760, %v1585_v37 }
 0x1ec   :  { %1360 = vmatmul.f32.vlgmr.msra.gmra.mxu1 %v1329_v46  ;;  %v1330_v48 = vsub.f32 %v1307_v45, %v1329_v46  ;;  %1587 = vmatpush.xpose.msrb.mxu3 %v1586_v39 }
 0x1ed   :  { %1633 = vmatpush.xpose.msra.mxu1 %v1556_v28 }
 0x1ee   :  { %1384 = vmatmul.f32.vlgmr.msra.gmra.mxu2 %v1330_v48  ;;  %v1331_v49 = vand.u32 4294901760, %v1330_v48 }
 0x1ef   :  { %1659 = vmatpush.xpose.msra.mxu2 %v1584_v35 }
 0x1f0   :  { %1408 = vmatmul.f32.vlgmr.msra.gmra.mxu3 %v1331_v49  ;;  %v1332_v50 = vsub.f32 %v1330_v48, %v1331_v49  ;;  %v1516_v49 = vld [vmem:[%s1999_s5] sm:$0x1] }
 0x1f1   :  { %1681 = vmatpush.xpose.msra.mxu3 %v1556_v28 }
 0x1f2   :  { %v1333_v51 = vand.u32 4294901760, %v1332_v50 }
 0x1f4   :  { %1334 = vmatmul.f32.vlgmr.msra.gmra.mxu0 %v1333_v51  ;;  %1454 = vmatmul.f32.vlgmr.msrb.gmra.mxu1 %v1329_v46 }
 0x1f5   :  { %1610 = vmatpush.xpose.msra.mxu0 %v1583_v31 }
 0x1fc   :  { %1432 = vmatmul.f32.vlgmr.msrb.gmra.mxu0 %v1329_v46 }
 0x269   :  { %v1361_v53 = vpop.f32.mrf.mxu1 }
 0x271   :  { %v1335_v54 = vpop.f32.mrf.mxu0  ;;  %v1385_v57 = vpop.f32.mrf.mxu2 }
 0x272   :  { %v1336_v55 = vadd.f32 %v1335_v54, %v1305_v52  ;;  %v1455_v63 = vpop.f32.mrf.mxu1 }
 0x273   :  { %v1409_v59 = vpop.f32.mrf.mxu3 }
 0x274   :  { %v1362_v56 = vadd.f32 %v1361_v53, %v1336_v55 }
 0x276   :  { %v1386_v58 = vadd.f32 %v1385_v57, %v1362_v56 }
 0x278   :  { %v1410_v60 = vadd.f32 %v1409_v59, %v1386_v58 }
 0x279   :  { %v1433_v61 = vpop.f32.mrf.mxu0 }
 0x27a   :  { %v1434_v62 = vadd.f32 %v1433_v61, %v1410_v60 }
 0x27c   :  { %v1456_v1 = vadd.f32 %v1455_v63, %v1434_v62 }
 0x27e   :  { %v1462_v2 = vsel %vm1461_vm12, %v1456_v1, 0.0  ;;  %v1459_v3 = vrot.slane %v1456_v1, 1 }
 0x27f   :  { %1463 = vadd.xlane.f32.xlu2 %v1462_v2 }
 0x280   :  { %v1465_v4 = vsel %vm1461_vm12, %v1459_v3, 0.0 }
 0x287   :  { %1466 = vadd.xlane.f32.xlu2 %v1465_v4  ;;  %v1522_v4 = vld [vmem:[%s2000_s7] sm:$0x1] }
 0x2f2   :  { %v1464_v13 = vpop.xlane.xlu2 %1463 }
 0x2f3   :  { %v1475_v14 = vmul.f32 %v1474_v12, %v1464_v13 }
 0x2f5   :  { %v1477_v15 = vsub.f32 %v1456_v1, %v1475_v14 }
 0x2f7   :  { %v1479_v16 = vmul.f32 %v1477_v15, %v1477_v15 }
 0x2f9   :  { %v1481_v17 = vsel %vm1461_vm12, %v1479_v16, 0.0 }
 0x2fa   :  { %1482 = vadd.xlane.f32.xlu0 %v1481_v17  ;;  %v1467_v18 = vpop.xlane.xlu2 %1466 }
 0x2fb   :  { %v1476_v19 = vmul.f32 %v1474_v12, %v1467_v18 }
 0x2fd   :  { %v1478_v20 = vsub.f32 %v1459_v3, %v1476_v19 }
 0x2ff   :  { %v1480_v21 = vmul.f32 %v1478_v20, %v1478_v20 }
 0x301   :  { %v1484_v22 = vsel %vm1461_vm12, %v1480_v21, 0.0 }
 0x302   :  { %1485 = vadd.xlane.f32.xlu1 %v1484_v22 }
 0x36d   :  { %v1483_v23 = vpop.xlane.xlu0 %1482 }
 0x36e   :  { %v1487_v24 = vmul.f32 %v1483_v23, %v1474_v12  ;;  %v1806_v23 = vmov 839922192  }
 0x370   :  { %v1489_v25 = vadd.f32 1e-05, %v1487_v24  ;;  %v1763_v24 = vunpack.c.l.s4 %v1806_v23 }
 0x372   :  { %1800 = vrsqrt.f32 %v1489_v25  ;;  %vm1497_vm0 = vweird.f32 %v1489_v25 }
 0x375   :  { %v1486_v29 = vpop.xlane.xlu1 %1485 }
 0x376   :  { %v1488_v30 = vmul.f32 %v1486_v29, %v1474_v12 }
 0x378   :  { %v1801_v33 = vpop.eup %1800  ;;  %v1490_v34 = vadd.f32 1e-05, %v1488_v30 }
 0x379   :  { %v1492_v36 = vmul.f32 %v1801_v33, %v1489_v25  ;;  %vm1498_vm15 = vweird.f32 %v1801_v33  ;;  %v1764_v25 = vunpack.c.0.s8 %v1763_v24 }
 0x37a   :  { %1802 = vrsqrt.f32 %v1490_v34  ;;  %vm1499_vm1 = vmor %vm1497_vm0, %vm1498_vm15  ;;  %vm1507_vm3 = vweird.f32 %v1490_v34 }
 0x37b   :  { %v1493_v38 = vmul.f32 %v1801_v33, %v1492_v36 }
 0x37d   :  { %v1494_v40 = vmul.f32 0.5, %v1493_v38 }
 0x37f   :  { %v1495_v41 = vsub.f32 1.5, %v1494_v40 }
 0x380   :  { %v1803_v42 = vpop.eup %1802 }
 0x381   :  { %v1496_v32 = vmul.f32 %v1801_v33, %v1495_v41  ;;  %v1502_v43 = vmul.f32 %v1803_v42, %v1490_v34  ;;  %vm1508_vm2 = vweird.f32 %v1803_v42 }
 0x382   :  { %vm1509_vm4 = vmor %vm1507_vm3, %vm1508_vm2 }
 0x383   :  { %v1500_v45 = vsel %vm1499_vm1, %v1801_v33, %v1496_v32  ;;  %v1503_v46 = vmul.f32 %v1803_v42, %v1502_v43 }
 0x384   :  { %v1511_v48 = vmul.f32 %v1500_v45, %v1477_v15 }
 0x385   :  { %v1504_v50 = vmul.f32 0.5, %v1503_v46 }
 0x386   :  { %v1514_v51 = vmul.f32 %v1513_v44, %v1511_v48 }
 0x387   :  { %v1505_v47 = vsub.f32 1.5, %v1504_v50 }
 0x388   :  { %v1517_v52 = vadd.f32 %v1516_v49, %v1514_v51 }
 0x389   :  { %v1506_v53 = vmul.f32 %v1803_v42, %v1505_v47 }
 0x38a   :  { %v1519_v54 = vmax.f32 %v1517_v52, 0.0 }
 0x38b   :  { %v1510_v55 = vsel %vm1509_vm4, %v1803_v42, %v1506_v53 }
 0x38c   :  { %1525 = vst [vmem:[#allocation1] ss:$9 sm:$0xff] %v1519_v54  ;;  %v1512_v56 = vmul.f32 %v1510_v55, %v1478_v20 }
 0x38e   :  { %v1515_v57 = vmul.f32 %v1513_v44, %v1512_v56 }
 0x390   :  { %v1518_v58 = vadd.f32 %v1516_v49, %v1515_v57 }
 0x392   :  { %v1520_v59 = vmax.f32 %v1518_v58, 0.0 }
 0x394   :  { %1527 = vst [vmem:[#allocation1 + $0x1] ss:$9 sm:$0xff] %v1520_v59 }
 0x39b   :  { %v1528_v60 = vld [vmem:[#allocation1] sm:$0xff] }
 0x39c   :  { %v1536_v61 = vsel %vm1535_vm14, %v1528_v60, 0  ;;  %1530 = vst [vmem:[#allocation1] ss:$9 sm:$0xff] %v1522_v4 }
 0x39d   :  { %v1558_v62 = vand.u32 4294901760, %v1536_v61  ;;  %1532 = vst [vmem:[#allocation1 + $0x1] ss:$9 sm:$0xff] %v1522_v4 }
 0x39f   :  { %1589 = vmatmul.f32.vlgmr.msrb.gmra.mxu3 %v1558_v62  ;;  %v1559_v63 = vsub.f32 %v1536_v61, %v1558_v62 }
 0x3a1   :  { %1613 = vmatmul.f32.vlgmr.msra.gmra.mxu0 %v1559_v63  ;;  %v1560_v1 = vand.u32 4294901760, %v1559_v63 }
 0x3a3   :  { %1637 = vmatmul.f32.vlgmr.msra.gmra.mxu1 %v1560_v1  ;;  %v1561_v2 = vsub.f32 %v1559_v63, %v1560_v1 }
 0x3a4   :  { %v1533_v7 = vld [vmem:[#allocation1] sm:$0xff] }
 0x3a5   :  { %v1562_v3 = vand.u32 4294901760, %v1561_v2 }
 0x3a7   :  { %1563 = vmatmul.f32.vlgmr.msrb.gmra.mxu2 %v1562_v3  ;;  %1683 = vmatmul.f32.vlgmr.msra.gmra.mxu3 %v1558_v62 }
 0x3af   :  { %1661 = vmatmul.f32.vlgmr.msra.gmra.mxu2 %v1558_v62 }
 0x41e   :  { %v1614_v12 = vpop.f32.mrf.mxu0 }
 0x420   :  { %v1638_v14 = vpop.f32.mrf.mxu1 }
 0x422   :  { %v1590_v8 = vpop.f32.mrf.mxu3 }
 0x42a   :  { %v1564_v9 = vpop.f32.mrf.mxu2  ;;  %v1684_v18 = vpop.f32.mrf.mxu3 }
 0x42b   :  { %v1565_v10 = vadd.f32 %v1564_v9, %v1533_v7 }
 0x42d   :  { %v1591_v11 = vadd.f32 %v1590_v8, %v1565_v10 }
 0x42f   :  { %v1615_v13 = vadd.f32 %v1614_v12, %v1591_v11 }
 0x431   :  { %v1639_v15 = vadd.f32 %v1638_v14, %v1615_v13 }
 0x432   :  { %v1662_v16 = vpop.f32.mrf.mxu2 }
 0x433   :  { %v1663_v17 = vadd.f32 %v1662_v16, %v1639_v15 }
 0x435   :  { %v1685_v19 = vadd.f32 %v1684_v18, %v1663_v17 }
 0x437   :  { %1690 = vxpose.xlu2.b32.start.end [1/1] (short) (narrow) %v1685_v19, 8  ;;  %v1688_v20 = vrot.slane %v1685_v19, 1 }
 0x439   :  { %1722 = vxpose.xlu0.b32.start.end [1/1] (short) (narrow) %v1688_v20, 8 }
 0x4a0   :  { %1785 = vset.pattern.permute.xlu0 %v1805_v5 }
 0x4d0   :  { %v1706_v21 = vpop.trf.xlu2 }
 0x4d1   :  { %1756 = vperm.xlu1 %1784, %v1706_v21  }
 0x4dd   :  { %v1738_v22 = vpop.trf.xlu0 }
 0x4de   :  { %1760 = vperm.xlu1 %1784, %v1738_v22  }
 0x543   :  { %v1757_v26 = vpop.permute.xlu1 %1756 }
 0x544   :  { %v1765_v27 = vperm.slane %v1757_v26, %v1764_v25 }
 0x546   :  { %v1772_v28 = vadd.f32 %v1765_v27, %v1855_v0 }
 0x548   :  { %1774 = vst [vmem:[%s2001_s8] sm:$0xff] %v1772_v28 }
 0x550   :  { %v1761_v29 = vpop.permute.xlu1 %1760 }
 0x551   :  { %v1769_v30 = vperm.slane %v1761_v29, %v1764_v25 }
 0x553   :  { %v1773_v31 = vadd.f32 %v1769_v30, %v1873_v6 }
 0x555   :  { %1775 = vst [vmem:[%s2001_s8 + $0x8] sm:$0xff] %v1773_v31 }

</bundles_post_ra>
